<compile_context>
chip_gen: v7x
topology: tpu7x:2x2x1
jax: 0.10.0
libtpu: 0.0.40
codegen_flags: <defaults>
</compile_context>

<pallas_src>
import functools

import jax
import jax.numpy as jnp
from jax.experimental import pallas as pl
from jax.experimental.pallas import tpu as pltpu


def _round_up(x, multiple):
    return (x + multiple - 1) // multiple * multiple


# ----------------------------------------------------------------------------
# Kernels
# ----------------------------------------------------------------------------
def _linear_remainder_kernel(x_ref, w_ref, b_ref, o_ref, acc_ref, *,
                             apply_relu, enable_bias):
    # pi(x | w') = act(x @ W + b), K-reduction over the last grid axis.
    k = pl.program_id(2)

    @pl.when(k == 0)
    def _():
        acc_ref[...] = jnp.zeros_like(acc_ref)

    acc_ref[...] += jnp.dot(x_ref[...], w_ref[...],
                            preferred_element_type=jnp.float32)

    @pl.when(k == pl.num_programs(2) - 1)
    def _():
        acc = acc_ref[...]
        if enable_bias:
            acc = acc + b_ref[...].astype(jnp.float32)  # bias added exactly once
        if apply_relu:
            acc = jnp.maximum(acc, 0.0)
        o_ref[...] = acc.astype(o_ref.dtype)


def _activation_kernel(x_ref, o_ref):
    # Identity remainder with an activation (example: ReLU).
    o_ref[...] = jnp.maximum(x_ref[...], 0.0).astype(o_ref.dtype)


# ----------------------------------------------------------------------------
# Wrappers
# ----------------------------------------------------------------------------
def identity_remainder(x, *, apply_relu=False, tm=512, tc=1024):
    """require_parameters=False path: pi(x) = act(x)."""
    B, m = x.shape
    if not apply_relu:
        # Default base_remainder config (no activation): the remainder is just
        # x — a copy kernel would only add a redundant HBM read+write.
        return x

    tm = min(tm, _round_up(B, 8))
    tc = min(tc, _round_up(m, 128))
    Mp, Cp = _round_up(B, tm), _round_up(m, tc)
    xp = jnp.pad(x, ((0, Mp - B), (0, Cp - m)))

    out = pl.pallas_call(
        _activation_kernel,
        out_shape=jax.ShapeDtypeStruct((Mp, Cp), x.dtype),
        grid_spec=pltpu.PrefetchScalarGridSpec(
            num_scalar_prefetch=0,
            grid=(Mp // tm, Cp // tc),
            in_specs=[pl.BlockSpec((tm, tc), lambda i, j: (i, j))],
            out_specs=pl.BlockSpec((tm, tc), lambda i, j: (i, j)),
        ),
        compiler_params=pltpu.CompilerParams(
            dimension_semantics=("parallel", "parallel"),
            vmem_limit_bytes=32 * 1024 * 1024,
        ),
    )(xp)
    return out[:B, :m]


def linear_remainder(x, w, b=None, *, apply_relu=False, enable_bias=True,
                     tm=256, tn=256, tk=256):
    """require_parameters=True path: pi(x | w') = act(x @ W + b)."""
    B, m = x.shape
    m2, n = w.shape
    assert m == m2
    out_dtype = x.dtype  # keep the caller's dtype contract; accumulate in f32

    # MXU/lane-aligned tiles (multiples of 128 on lane axes, clamped for small
    # problems); pad every dim to a tile multiple with zeros (math unchanged).
    tm = min(tm, _round_up(B, 8))
    tn = min(tn, _round_up(n, 128))
    tk = min(tk, _round_up(m, 128))
    Mp, Np, Kp = _round_up(B, tm), _round_up(n, tn), _round_up(m, tk)

    xp = jnp.pad(x, ((0, Mp - B), (0, Kp - m)))
    wp = jnp.pad(w, ((0, Kp - m), (0, Np - n)))
    if b is None or not enable_bias:
        bp = jnp.zeros((1, Np), dtype=out_dtype)
    else:
        bp = jnp.pad(jnp.reshape(b, (1, n)), ((0, 0), (0, Np - n)))

    grid = (Mp // tm, Np // tn, Kp // tk)

    # Explicit VMEM budget with headroom (double-buffered inputs/outputs +
    # resident f32 accumulator); safe on v7x's 64 MiB physical VMEM.
    in_bytes = xp.dtype.itemsize
    out_bytes = jnp.dtype(out_dtype).itemsize
    vmem_bytes = (2 * (tm * tk + tk * tn + tn) * in_bytes
                  + 2 * tm * tn * out_bytes + tm * tn * 4)
    vmem_limit = int(min(max(2 * vmem_bytes, 16 * 1024 * 1024),
                         32 * 1024 * 1024))

    out = pl.pallas_call(
        functools.partial(_linear_remainder_kernel,
                          apply_relu=apply_relu, enable_bias=enable_bias),
        out_shape=jax.ShapeDtypeStruct((Mp, Np), out_dtype),
        grid_spec=pltpu.PrefetchScalarGridSpec(
            num_scalar_prefetch=0,
            grid=grid,
            in_specs=[
                pl.BlockSpec((tm, tk), lambda i, j, k: (i, k)),
                pl.BlockSpec((tk, tn), lambda i, j, k: (k, j)),
                pl.BlockSpec((1, tn), lambda i, j, k: (0, j)),
            ],
            out_specs=pl.BlockSpec((tm, tn), lambda i, j, k: (i, j)),
            scratch_shapes=[pltpu.VMEM((tm, tn), jnp.float32)],
        ),
        compiler_params=pltpu.CompilerParams(
            dimension_semantics=("parallel", "parallel", "arbitrary"),
            vmem_limit_bytes=vmem_limit,
        ),
    )(xp, wp, bp)
    return out[:B, :n]


# ----------------------------------------------------------------------------
# Main
# ----------------------------------------------------------------------------
if __name__ == "__main__":
    key = jax.random.PRNGKey(0)
    kx, kw, kb = jax.random.split(key, 3)

    batch, m, n = 8, 32, 16  # small shapes: pi: R^32 -> R^16

    x = jax.random.normal(kx, (batch, m), dtype=jnp.float32)
    # Deterministic synthetic parameters (no checkpoint loading).
    w = jax.random.normal(kw, (m, n), dtype=jnp.float32) * (1.0 / jnp.sqrt(m))
    b = jax.random.normal(kb, (1, n), dtype=jnp.float32) * 0.01

    # Default base_remainder config: no parameters, no bias, no activation.
    out_identity = identity_remainder(x, apply_relu=False)
    # Identity remainder with an activation (exercises the elementwise kernel).
    out_identity_act = identity_remainder(x, apply_relu=True)
    # Parameterized remainder: require_parameters=True, enable_bias=True,
    # with ReLU as an example activation_functions entry.
    out_linear = linear_remainder(x, w, b, apply_relu=True, enable_bias=True)
    jax.block_until_ready((out_identity, out_identity_act, out_linear))

    # Reference checks in plain JAX.
    ref_identity = x
    ref_identity_act = jnp.maximum(x, 0.0)
    ref_linear = jnp.maximum(x @ w + b, 0.0)
    assert jnp.allclose(out_identity, ref_identity, atol=1e-5, rtol=1e-5)
    assert jnp.allclose(out_identity_act, ref_identity_act, atol=1e-5, rtol=1e-5)
    assert jnp.allclose(out_linear, ref_linear, atol=1e-4, rtol=1e-4)

    # TODO(synk): the abstract `forward` has no fixed semantics; the concrete
    # identity / linear(x@W+b) + activation remainders are covered above.
    print("KERNEL_OK")
</pallas_src>

<mosaic_0001>
module attributes {stable_mosaic.version = 11 : i64} {
  func.func @_activation_kernel(%arg0: i32, %arg1: i32, %arg2: memref<8x128xf32, #tpu.memory_space<vmem>>, %arg3: memref<8x128xf32, #tpu.memory_space<vmem>>) attributes {dimension_semantics = [#tpu.dimension_semantics<parallel>, #tpu.dimension_semantics<parallel>], iteration_bounds = array<i64: 1, 1>, scalar_prefetch = 0 : i64, scratch_operands = 0 : i64, tpu.core_type = #tpu.core_type<tc>, window_params = [{transform_indices = @transform_0, window_bounds = array<i64: 8, 128>}, {transform_indices = @transform_1, window_bounds = array<i64: 8, 128>}]} {
    %c0 = arith.constant 0 : index
    %c0_0 = arith.constant 0 : index
    %0 = vector.load %arg2[%c0, %c0_0] : memref<8x128xf32, #tpu.memory_space<vmem>>, vector<8x128xf32>
    %cst = arith.constant 0.000000e+00 : f32
    %1 = vector.broadcast %cst : f32 to vector<8x128xf32>
    %2 = arith.maximumf %0, %1 : vector<8x128xf32>
    %c0_1 = arith.constant 0 : index
    %c0_2 = arith.constant 0 : index
    %3 = vector.load %arg3[%c0_1, %c0_2] : memref<8x128xf32, #tpu.memory_space<vmem>>, vector<8x128xf32>
    tpu.vector_store %arg3[%c0_1, %c0_2], %2 {strides = array<i32>} : memref<8x128xf32, #tpu.memory_space<vmem>>, vector<8x128xf32>,
    return
  }
  func.func @transform_0(%arg0: i32, %arg1: i32) -> (i32, i32) {
    %c0_i32 = arith.constant 0 : i32
    return %arg0, %arg1 : i32, i32
  }
  func.func @transform_1(%arg0: i32, %arg1: i32) -> (i32, i32) {
    %c0_i32 = arith.constant 0 : i32
    return %arg0, %arg1 : i32, i32
  }
}

</mosaic_0001>

<bundles_post_ra>
// kernel: tpu_custom_call.1
= control target key start
LH: loop header
LB: loop body
LE: loop exit
PB: predicated region body
PF: predicated region fallthrough
CT: control target
= control target key end

     0   :  { %6 = vsyncpa [#allocation3], 0  ;;  %s125_s0 = inlined_call_operand.hbm [shape: f32[8,128], index: 0, kind: input, shape index: {}]   ;;  %s126_s1 = inlined_call_operand.hbm [shape: f32[8,128], index: 1, kind: output, shape index: {}]  }
   0x1   :  { %7 = vsyncpa [#allocation4], 0  ;;  %s89_s6 = smov [#allocation2]   ;;  %s41_s10 = scalar_lea.hbm %s125_s0, 128 }
   0x2   :  { %s14_s7 = sshll.u32 %s89_s6, 4  ;;  %p42_p0 = scmp.ne.s32.totalorder %s125_s0, %s41_s10  ;;  %s15_s7 = int_to_ptr.vmem [resolvable:$true] %s14_s7 }
   0x3   :  { %p45_p1 = scmp.lt.u32.totalorder %s41_s10, %s125_s0 }
   0x5   :  { %p47_p2 = pnand %p45_p1, %p42_p0 }
   0x7   :  { %50 = shalt.err (!%p47_p2)
}
   0x8   :  { %s51_s15 = scalar_lea.vmem %s15_s7, 128  ;;  %p56_p4 = scmp.lt.s32.totalorder %s15_s7, %s15_s7 }
   0x9   :  { %p52_p3 = scmp.ne.s32.totalorder %s15_s7, %s51_s15  ;;  %p57_p5 = scmp.lt.s32.totalorder %s51_s15, %s51_s15 }
   0xb   :  { %p58_p6 = por %p57_p5, %p56_p4 }
   0xd   :  { %p59_p7 = pnand %p58_p6, %p52_p3 }
   0xf   :  { %62 = shalt.err (!%p59_p7)
}
  0x10   :  { %17 = dma.hbm_to_vmem [thread:$0]  %s125_s0, 128, %s15_s7, [#allocation3]  }
  0x11   :  { %85 = dma.done.wait [#allocation3], 128  }
  0x12   :  { %86 = vsyncadd [#allocation3], 4294967168  ;;  %s90_s18 = smov [#allocation5]   ;;  %v21_v0 = vld [vmem:[#allocation2] sm:$0xff] }
  0x13   :  { %s30_s19 = sshll.u32 %s90_s18, 4  ;;  %v22_v1 = vmax.f32 %v21_v0, 0.0  ;;  %s31_s19 = int_to_ptr.vmem [resolvable:$true] %s30_s19 }
  0x14   :  { %s63_s20 = scalar_lea.vmem %s31_s19, 128  ;;  %p68_p9 = scmp.lt.s32.totalorder %s31_s19, %s31_s19 }
  0x15   :  { %23 = vst [vmem:[#allocation5] sm:$0xff] %v22_v1  ;;  %p64_p8 = scmp.ne.s32.totalorder %s31_s19, %s63_s20  ;;  %p69_p10 = scmp.lt.s32.totalorder %s63_s20, %s63_s20 }
  0x17   :  { %p70_p11 = por %p69_p10, %p68_p9 }
  0x19   :  { %p71_p12 = pnand %p70_p11, %p64_p8 }
  0x1b   :  { %74 = shalt.err (!%p71_p12)
}
  0x1c   :  { %s75_s23 = scalar_lea.hbm %s126_s1, 128 }
  0x1d   :  { %p76_p13 = scmp.ne.s32.totalorder %s126_s1, %s75_s23  ;;  %p79_p0 = scmp.lt.u32.totalorder %s75_s23, %s126_s1 }
  0x1f   :  { %p81_p1 = pnand %p79_p0, %p76_p13 }
  0x21   :  { %84 = shalt.err (!%p81_p1)
}
  0x22   :  { %33 = dma.vmem_to_hbm [thread:$0]  %s31_s19, 128, %s126_s1, [#allocation4]  }
  0x23   :  { %87 = dma.done.wait [#allocation4], 128  }
  0x24   :  { %88 = vsyncadd [#allocation4], 4294967168 }
  0x25   :  { %37 = vsyncpa [#allocation3], 1 }
  0x26   :  { %38 = vsyncpa [#allocation4], 1 }

</bundles_post_ra>
